<compile_context>
chip_gen: v5e
topology: v5e:2x2
jax: 0.10.0
libtpu: 0.0.40
codegen_flags: <defaults>
</compile_context>

<pallas_src>
import functools

import numpy as np
import jax
import jax.numpy as jnp
from jax.experimental import pallas as pl
from jax.experimental.pallas import tpu as pltpu


# ------------------------------ Pallas kernel ------------------------------
def _qconv_kernel(xp_ref, zs_ref, w_ref, mt2_ref, o_ref):
    """Fused quantum-patch evaluation for one tile of TM patches.

    xp_ref  : (n, TM)   f32  flattened patches, patch index lane-dense
    zs_ref  : (N, n)    f32  Zs = -0.5 * (1 - 2*bit_i(s))     (phase matrix)
    w_ref   : (2N, 2N)  bf16 W  = [[Vr, -Vi], [Vi, Vr]]       (RX-layer unitary)
    mt2_ref : (n_pad, 2N) f32 Mt2 = [Mt | Mt] / N, rows zero-padded to n_pad
    o_ref   : (n_pad, TM) f32 per-patch expectation of each measured bit
    """
    xpT = xp_ref[...]                                                    # (n, TM)

    # Phase after H + RZ(x_i) + RZZ(x_i*x_j):
    #   phi = -t/2 - (t^2 - sum x_i^2)/4 = t' - t'^2 + q/4,  t' = Zs @ x = -t/2
    tp = jnp.dot(zs_ref[...], xpT, preferred_element_type=jnp.float32)   # (N, TM)
    q4 = 0.25 * jnp.sum(xpT * xpT, axis=0, keepdims=True)                # (1, TM)
    phi = tp - tp * tp + q4

    # Unnormalized amplitudes (the 1/sqrt(N) is folded into Mt2): a = [cos; sin].
    # TODO(synk): on v6e/v7x the EUP supports bf16 cos/sin; compute these in
    # bf16 there if the EUP becomes the binding slot (keep f32 on v5e).
    a2 = jnp.concatenate([jnp.cos(phi), jnp.sin(phi)], axis=0)           # (2N, TM)

    # psi (stacked real/imag) = W @ a: ONE bf16 MXU dot, f32 accumulation.
    psi2 = jnp.dot(w_ref[...], a2.astype(w_ref.dtype),
                   preferred_element_type=jnp.float32)                   # (2N, TM)

    # |psi|^2 + CX-ring permutation + bit readout + 1/N in one small dot.
    # (only n_pad=8 output rows -> MXU cost negligible, keep f32 for accuracy)
    o_ref[...] = jnp.dot(mt2_ref[...], psi2 * psi2,
                         preferred_element_type=jnp.float32)             # (n_pad, TM)


# --------------------- host-side one-time constant tables ------------------
def build_qconv_constants(weight, kernel_size):
    """Circuit-structure + weight tables (one-time, host side)."""
    k = kernel_size
    n = k * k
    N = 1 << n
    n_pad = ((n + 7) // 8) * 8            # output rows padded to full sublanes
    w = np.asarray(weight, dtype=np.float64).reshape(-1)

    s = np.arange(N)
    bits = (s[:, None] >> np.arange(n)[None, :]) & 1                 # bit_i(s)
    Z = (1.0 - 2.0 * bits).astype(np.float64)                        # (N, n)

    # V = kron(RX(w_{n-1}), ..., RX(w_0))   (qiskit: qubit 0 = LSB of index)
    def rx(theta):
        c, sn = np.cos(theta / 2.0), np.sin(theta / 2.0)
        return np.array([[c, -1j * sn], [-1j * sn, c]], dtype=np.complex128)

    V = np.array([[1.0 + 0.0j]])
    for qb in range(n - 1, -1, -1):
        V = np.kron(V, rx(w[qb]))
    Vr = V.real.astype(np.float64)
    Vi = V.imag.astype(np.float64)
    W = np.block([[Vr, -Vi], [Vi, Vr]])                              # (2N, 2N)

    # CX ring cx(i, (i+1)%n) applied sequentially = basis permutation sigma.
    # Fold sigma and qiskit's reversed bitstring order into the readout:
    #   Mt[m, s] = bit_{n-1-m}(sigma(s)).
    Mt = np.zeros((n, N), dtype=np.float64)
    for st in range(N):
        b = [(st >> qb) & 1 for qb in range(n)]
        for i in range(n):
            b[(i + 1) % n] ^= b[i]
        for m in range(n):
            Mt[m, st] = float(b[n - 1 - m])

    # Fold the 1/N amplitude normalization and the Re^2+Im^2 sum into the
    # readout matrix; zero-pad rows n -> n_pad for unmasked sublane stores.
    Mt2 = np.zeros((n_pad, 2 * N), dtype=np.float64)
    Mt2[:n, :N] = Mt / N
    Mt2[:n, N:] = Mt / N

    return {
        # kernel-facing (Zs has the -1/2 phase factor folded in)
        "Zs": jnp.asarray((-0.5 * Z).astype(np.float32)),
        "W": jnp.asarray(W.astype(np.float32)).astype(jnp.bfloat16),
        "Mt2": jnp.asarray(Mt2.astype(np.float32)),
        # f32 copies for the plain-JAX reference checks
        "Z": jnp.asarray(Z.astype(np.float32)),
        "Vr": jnp.asarray(Vr.astype(np.float32)),
        "Vi": jnp.asarray(Vi.astype(np.float32)),
        "Mt": jnp.asarray(Mt.astype(np.float32)),
    }


# ------------------------------- JAX glue ----------------------------------
def _extract_patches(x, kernel_size, stride):
    """(B, H, W) -> (B, k*k, Ho*Wo): a single reshape/transpose layout pass."""
    B, H, W = x.shape
    k = kernel_size
    assert H % stride == 0 and W % stride == 0 and k <= stride, (
        "expects clean non-overlapping windows (kernel_size <= stride)")
    # TODO(synk): overlapping windows (kernel_size > stride) would need a
    # gather here; the reference configuration uses kernel_size == stride.
    Ho, Wo = H // stride, W // stride
    xp = x.reshape(B, Ho, stride, Wo, stride)[:, :, :k, :, :k]
    xp = jnp.transpose(xp, (0, 2, 4, 1, 3)).reshape(B, k * k, Ho * Wo)
    return xp, (Ho, Wo)


def quantum_conv2d_forward(x, consts, kernel_size, stride, tile_m=None):
    k = kernel_size
    n = k * k
    N = 1 << n
    n_pad = consts["Mt2"].shape[0]

    xp, (Ho, Wo) = _extract_patches(x, k, stride)
    B = xp.shape[0]
    Ppi = Ho * Wo                                       # patches per image

    # Tile width over the lane-dense patch axis, sized from a VMEM formula:
    # ~(10 live (2N,TM) f32-equivalent arrays + double-buffered I/O) against an
    # 8 MiB budget -> 2048-8192 for k=2 (N=16), shrinking automatically for
    # larger k; safely inside every generation's scoped VMEM (v7x: 32 MiB).
    if tile_m is None:
        per_col_bytes = (10 * 2 * N + 4 * (n + n_pad)) * 4
        tile_m = ((8 * 1024 * 1024) // per_col_bytes) // 128 * 128
        tile_m = int(max(128, min(8192, tile_m)))
    TM = min(tile_m, pl.cdiv(Ppi, 128) * 128)
    PP = pl.cdiv(Ppi, TM) * TM
    if PP != Ppi:
        xp = jnp.pad(xp, ((0, 0), (0, 0), (0, PP - Ppi)))

    # Grid over (batch, patch tiles): both parallel; >= 2 total steps so the
    # two v7x TensorCores both get work.
    grid = (B, PP // TM)

    cost = pl.CostEstimate(
        flops=int(2 * (2 * N * 2 * N + N * n + n_pad * 2 * N) * B * PP),
        transcendentals=int(2 * N * B * PP),
        bytes_accessed=int(4 * (n + n_pad) * B * PP),
    )

    out = pl.pallas_call(
        _qconv_kernel,
        out_shape=jax.ShapeDtypeStruct((B, n_pad, PP), jnp.float32),
        grid=grid,
        in_specs=[
            pl.BlockSpec((None, n, TM), lambda b, i: (b, 0, i)),     # patches
            pl.BlockSpec((N, n), lambda b, i: (0, 0)),               # Zs  (VMEM-resident)
            pl.BlockSpec((2 * N, 2 * N), lambda b, i: (0, 0)),       # W   (VMEM-resident)
            pl.BlockSpec((n_pad, 2 * N), lambda b, i: (0, 0)),       # Mt2 (VMEM-resident)
        ],
        out_specs=pl.BlockSpec((None, n_pad, TM), lambda b, i: (b, 0, i)),
        compiler_params=pltpu.CompilerParams(
            dimension_semantics=("parallel", "parallel"),
            vmem_limit_bytes=32 * 1024 * 1024),
        cost_estimate=cost,
    )(xp, consts["Zs"], consts["W"], consts["Mt2"])

    # Kernel already emitted the final layout; only a small row/column slice
    # and a free reshape remain (no full transpose pass over HBM).
    return out[:, :n, :Ppi].reshape(B, n, Ho, Wo)


# ------------------------ plain-JAX references (checks) ---------------------
def _reference_exact(xpT, c):
    """Exact f32 statevector reference (unfused math)."""
    hp = jax.lax.Precision.HIGHEST
    N = c["Z"].shape[0]
    t = jnp.dot(c["Z"], xpT, precision=hp)
    q = jnp.sum(xpT * xpT, axis=0, keepdims=True)
    phi = -0.5 * t - 0.25 * (t * t - q)
    a_r = jnp.cos(phi) / jnp.sqrt(float(N))
    a_i = jnp.sin(phi) / jnp.sqrt(float(N))
    p_r = jnp.dot(c["Vr"], a_r, precision=hp) - jnp.dot(c["Vi"], a_i, precision=hp)
    p_i = jnp.dot(c["Vr"], a_i, precision=hp) + jnp.dot(c["Vi"], a_r, precision=hp)
    return jnp.dot(c["Mt"], p_r * p_r + p_i * p_i, precision=hp)


def _reference_mirrored(xpT, c):
    """Plain-JAX mirror of the kernel numerics (same bf16 MXU cast)."""
    hp = jax.lax.Precision.HIGHEST
    tp = jnp.dot(c["Zs"], xpT, precision=hp)
    q4 = 0.25 * jnp.sum(xpT * xpT, axis=0, keepdims=True)
    phi = tp - tp * tp + q4
    a2 = jnp.concatenate([jnp.cos(phi), jnp.sin(phi)], axis=0)
    psi2 = jnp.dot(c["W"], a2.astype(jnp.bfloat16),
                   preferred_element_type=jnp.float32)
    return jnp.dot(c["Mt2"], psi2 * psi2, precision=hp,
                   preferred_element_type=jnp.float32)


if __name__ == "__main__":
    key = jax.random.PRNGKey(0)
    wkey, xkey = jax.random.split(key)

    kernel_size, stride = 2, 2
    B, H, W = 2, 16, 16

    weight = jax.random.normal(wkey, (kernel_size, kernel_size), jnp.float32)
    x = jax.random.normal(xkey, (B, H, W), jnp.float32)

    consts = build_qconv_constants(weight, kernel_size)

    fwd = jax.jit(functools.partial(
        quantum_conv2d_forward, consts=consts,
        kernel_size=kernel_size, stride=stride))
    out = jax.block_until_ready(fwd(x))

    n = kernel_size ** 2
    Ho, Wo = H // stride, W // stride
    assert out.shape == (B, n, Ho, Wo), out.shape
    assert bool(jnp.all(jnp.isfinite(out)))
    # outputs are per-qubit P(bit = 1) expectations -> inside [0, 1]
    assert bool(jnp.all((out >= -2e-2) & (out <= 1.0 + 2e-2)))

    # Cross-check the Pallas kernel against plain-JAX statevector references.
    xp, _ = _extract_patches(x, kernel_size, stride)
    xpT = jnp.transpose(xp, (1, 0, 2)).reshape(n, B * Ho * Wo)

    # (1) mirror of the kernel numerics (same bf16 cast) -> tight agreement;
    #     any bit-order / CX-permutation bug would show up as O(0.1) error.
    ref_m = _reference_mirrored(xpT, consts)[:n]
    ref_m = jnp.transpose(ref_m.reshape(n, B, Ho, Wo), (1, 0, 2, 3))
    err_m = float(jnp.max(jnp.abs(out - ref_m)))
    assert err_m < 5e-3, err_m   # typically ~1e-6; slack for cos/sin impl deltas

    # (2) exact f32 statevector -> bound set by the bf16 MXU cast (~1e-2),
    #     far below the ~3% shot noise of the 1024-shot Aer module it emulates.
    ref_e = _reference_exact(xpT, consts)
    ref_e = jnp.transpose(ref_e.reshape(n, B, Ho, Wo), (1, 0, 2, 3))
    err_e = float(jnp.max(jnp.abs(out - ref_e)))
    assert err_e < 3e-2, err_e

    print("KERNEL_OK")
</pallas_src>

<mosaic_0001>
module attributes {stable_mosaic.version = 11 : i64} {
  func.func @_qconv_kernel(%arg0: i32, %arg1: i32, %arg2: memref<1x4x128xf32, #tpu.memory_space<vmem>>, %arg3: memref<16x4xf32, #tpu.memory_space<vmem>>, %arg4: memref<32x32xbf16, #tpu.memory_space<vmem>>, %arg5: memref<8x32xf32, #tpu.memory_space<vmem>>, %arg6: memref<1x8x128xf32, #tpu.memory_space<vmem>>) attributes {dimension_semantics = [#tpu.dimension_semantics<parallel>, #tpu.dimension_semantics<parallel>], iteration_bounds = array<i64: 2, 1>, scalar_prefetch = 0 : i64, scratch_operands = 0 : i64, tpu.core_type = #tpu.core_type<tc>, window_params = [{transform_indices = @transform_0, window_bounds = array<i64: 1, 4, 128>}, {pipeline_mode = #tpu.pipeline_mode<synchronous>, transform_indices = @transform_1, window_bounds = array<i64: 16, 4>}, {pipeline_mode = #tpu.pipeline_mode<synchronous>, transform_indices = @transform_2, window_bounds = array<i64: 32, 32>}, {pipeline_mode = #tpu.pipeline_mode<synchronous>, transform_indices = @transform_3, window_bounds = array<i64: 8, 32>}, {transform_indices = @transform_4, window_bounds = array<i64: 1, 8, 128>}]} {
    %c0 = arith.constant 0 : index
    %c0_0 = arith.constant 0 : index
    %c0_1 = arith.constant 0 : index
    %0 = vector.load %arg2[%c0, %c0_0, %c0_1] : memref<1x4x128xf32, #tpu.memory_space<vmem>>, vector<1x4x128xf32>
    %1 = vector.shape_cast %0 : vector<1x4x128xf32> to vector<4x128xf32>
    %c0_2 = arith.constant 0 : index
    %c0_3 = arith.constant 0 : index
    %2 = vector.load %arg3[%c0_2, %c0_3] : memref<16x4xf32, #tpu.memory_space<vmem>>, vector<16x4xf32>
    %cst = arith.constant dense<0.000000e+00> : vector<16x128xf32>
    %3 = tpu.matmul %2, %1, %cst {dimension_numbers = #tpu.dot_dimension_numbers<[1], [0], [0], [1], [0, 0, 1, 1], [], []>} : vector<16x4xf32>, vector<4x128xf32>, vector<16x128xf32> -> vector<16x128xf32>
    %4 = arith.mulf %1, %1 : vector<4x128xf32>
    %cst_4 = arith.constant dense<0.000000e+00> : vector<128xf32>
    %5 = vector.multi_reduction <add>, %4, %cst_4 [0] : vector<4x128xf32> to vector<128xf32>
    %6 = vector.shape_cast %5 : vector<128xf32> to vector<1x128xf32>
    %cst_5 = arith.constant 2.500000e-01 : f32
    %7 = vector.broadcast %cst_5 : f32 to vector<1x128xf32>
    %8 = arith.mulf %7, %6 : vector<1x128xf32>
    %9 = arith.mulf %3, %3 : vector<16x128xf32>
    %10 = arith.subf %3, %9 : vector<16x128xf32>
    %11 = vector.broadcast %8 : vector<1x128xf32> to vector<16x128xf32>
    %12 = arith.addf %10, %11 : vector<16x128xf32>
    %13 = math.cos %12 : vector<16x128xf32>
    %14 = math.sin %12 : vector<16x128xf32>
    %15 = tpu.concatenate %13, %14 in 0 : vector<16x128xf32>, vector<16x128xf32> -> vector<32x128xf32>
    %c0_6 = arith.constant 0 : index
    %c0_7 = arith.constant 0 : index
    %16 = vector.load %arg4[%c0_6, %c0_7] : memref<32x32xbf16, #tpu.memory_space<vmem>>, vector<32x32xbf16>
    %17 = arith.truncf %15 : vector<32x128xf32> to vector<32x128xbf16>
    %cst_8 = arith.constant dense<0.000000e+00> : vector<32x128xf32>
    %18 = tpu.matmul %16, %17, %cst_8 {dimension_numbers = #tpu.dot_dimension_numbers<[1], [0], [0], [1], [0, 0, 1, 1], [], []>} : vector<32x32xbf16>, vector<32x128xbf16>, vector<32x128xf32> -> vector<32x128xf32>
    %c0_9 = arith.constant 0 : index
    %c0_10 = arith.constant 0 : index
    %19 = vector.load %arg5[%c0_9, %c0_10] : memref<8x32xf32, #tpu.memory_space<vmem>>, vector<8x32xf32>
    %20 = arith.mulf %18, %18 : vector<32x128xf32>
    %cst_11 = arith.constant dense<0.000000e+00> : vector<8x128xf32>
    %21 = tpu.matmul %19, %20, %cst_11 {dimension_numbers = #tpu.dot_dimension_numbers<[1], [0], [0], [1], [0, 0, 1, 1], [], []>} : vector<8x32xf32>, vector<32x128xf32>, vector<8x128xf32> -> vector<8x128xf32>
    %c0_12 = arith.constant 0 : index
    %c0_13 = arith.constant 0 : index
    %c0_14 = arith.constant 0 : index
    %22 = vector.load %arg6[%c0_12, %c0_13, %c0_14] : memref<1x8x128xf32, #tpu.memory_space<vmem>>, vector<1x8x128xf32>
    %23 = vector.shape_cast %22 : vector<1x8x128xf32> to vector<8x128xf32>
    %24 = vector.shape_cast %21 : vector<8x128xf32> to vector<1x8x128xf32>
    tpu.vector_store %arg6[%c0_12, %c0_13, %c0_14], %24 {strides = array<i32>} : memref<1x8x128xf32, #tpu.memory_space<vmem>>, vector<1x8x128xf32>,
    return
  }
  func.func @transform_0(%arg0: i32, %arg1: i32) -> (i32, i32, i32) {
    %c0_i32 = arith.constant 0 : i32
    %c0_i32_0 = arith.constant 0 : i32
    return %arg0, %c0_i32, %arg1 : i32, i32, i32
  }
  func.func @transform_1(%arg0: i32, %arg1: i32) -> (i32, i32) {
    %c0_i32 = arith.constant 0 : i32
    %c0_i32_0 = arith.constant 0 : i32
    %c0_i32_1 = arith.constant 0 : i32
    return %c0_i32, %c0_i32_0 : i32, i32
  }
  func.func @transform_2(%arg0: i32, %arg1: i32) -> (i32, i32) {
    %c0_i32 = arith.constant 0 : i32
    %c0_i32_0 = arith.constant 0 : i32
    %c0_i32_1 = arith.constant 0 : i32
    return %c0_i32, %c0_i32_0 : i32, i32
  }
  func.func @transform_3(%arg0: i32, %arg1: i32) -> (i32, i32) {
    %c0_i32 = arith.constant 0 : i32
    %c0_i32_0 = arith.constant 0 : i32
    %c0_i32_1 = arith.constant 0 : i32
    return %c0_i32, %c0_i32_0 : i32, i32
  }
  func.func @transform_4(%arg0: i32, %arg1: i32) -> (i32, i32, i32) {
    %c0_i32 = arith.constant 0 : i32
    %c0_i32_0 = arith.constant 0 : i32
    return %arg0, %c0_i32, %arg1 : i32, i32, i32
  }
}

</mosaic_0001>

<bundles_post_ra>
// kernel: quantum_conv2d_forward.1
= control target key start
LH: loop header
LB: loop body
LE: loop exit
PB: predicated region body
PF: predicated region fallthrough
CT: control target
= control target key end

     0   :  { %s1166_s15 = smov 0   ;;  %s1168_s16 = smov 0   ;;  %s1394_s0 = inlined_call_operand.vmem [shape: f32[2,4,128], index: 0, kind: input, shape index: {}]   ;;  %s1395_s1 = inlined_call_operand.vmem [shape: f32[16,4], index: 1, kind: input, shape index: {}]   ;;  %s1396_s2 = inlined_call_operand.vmem [shape: bf16[32,32], index: 2, kind: input, shape index: {}]   ;;  %s1397_s3 = inlined_call_operand.vmem [shape: f32[8,32], index: 3, kind: input, shape index: {}]   ;;  %s1398_s4 = inlined_call_operand.vmem [shape: f32[2,8,128], index: 4, kind: output, shape index: {}]  }
   0x1   :  { %s1170_s17 = smov 0  }
   0x2 LB: > { %s26_s18 = sadd.s32 1, %s1128_s16  ;;  %p1044_p0 = scmp.ge.s32.totalorder %s1132_s17, 1  ;;  %s1132_s17 = sphi %s1170_s17, %s14_s17   ;;  %s1128_s16 = sphi %s1168_s16, %s1404_s16   ;;  %s1124_s15 = sphi %s1166_s15, %s1403_s15  }
   0x3   : > { %p28_p1 = scmp.ge.s32.totalorder %s26_s18, 2  ;;  %p180_p2 = scmp.lt.s32.totalorder %s1132_s17, 3 }
   0x5   : > { %s1406_s18 = smov (%p28_p1, %s26_s18), 0  ;;  %p181_p3 = pnand %p1044_p0, %p180_p2 }
   0x6   : > { %p210_p4 = scmp.lt.s32.totalorder (!%p181_p3), %s1124_s15, 1 }
   0x7   : > { %184 = sbr.rel (%p181_p3) target bundleno = 555 (0x22b), region = 36 }
   0xc   : > { %s1408_s15 = smov (!%p210_p4, %s1124_s15), 1  ;;  %vm235_vm0 = vcmask 1043456   ;;  %v226_v0 = vld [vmem:[%s1395_s1] sm:$0xff]  ;;  %vm228_vm1 = vcmask 31744   ;;  %v227_v4 = vld [vmem:[%s1395_s1 + $0x8] sm:$0xff] }
   0xd   : > { %s1045_s19 = sshll.u32 %s1408_s15, 2  ;;  %v1134_v36 = vmov 2102212464   ;;  %v1135_v38 = vmov 920167782   ;;  %s1046_s7 = sshll.u32 %s1408_s15, 3 }
   0xe   : > { %s216_s22 = scalar_lea.vmem %s1394_s0, %s1045_s19  ;;  %v1136_v41 = vmov 683565275   ;;  %v1137_v44 = vmov 1326507024   ;;  %v1138_v46 = vmov 2475754826   ;;  %s223_s10 = scalar_lea.vmem %s1398_s4, %s1046_s7 }
   0xf   : > { %v225_v1 = vld [vmem:[%s216_s22] sm:$0xf]  ;;  %v1139_v50 = vmov 2131351028  }
  0x10   : > { %1047 = vmatpush.msk.msra.mxu0 %vm235_vm0, %v225_v1  ;;  %v262_v2 = vmul.f32 %v225_v1, %v225_v1 }
  0x11   : > { %1048 = vmatmul.msk.f32.vlgmr.msra.gmra.mxu0 %vm228_vm1, %v226_v0 }
  0x12   : > { %v263_v3 = vsel %vm235_vm0, %v262_v2, 0.0 }
  0x13   : > { %v264_v5 = vrot.slane %v263_v3, 4 }
  0x15   : > { %v265_v6 = vadd.f32 %v264_v5, %v263_v3 }
  0x17   : > { %v266_v7 = vrot.slane %v265_v6, 2 }
  0x19   : > { %1049 = vmatmul.msk.f32.gmra.mxu0 %vm228_vm1, %v227_v4  ;;  %v267_v8 = vadd.f32 %v266_v7, %v265_v6 }
  0x1b   : > { %v268_v9 = vrot.slane %v267_v8, 1 }
  0x1d   : > { %v269_v10 = vadd.f32 %v268_v9, %v267_v8 }
  0x1f   : > { %v270_v12 = vmul.f32 0.25, %v269_v10 }
  0x8e   : > { %v256_v11 = vpop.f32.mrf.mxu0 }
  0x8f   : > { %v271_v13 = vmul.f32 %v256_v11, %v256_v11 }
  0x91   : > { %v273_v14 = vsub.f32 %v256_v11, %v271_v13 }
  0x93   : > { %v1196_v15 = vadd.f32 %v273_v14, %v270_v12 }
  0x95   : > { %v280_v16 = vand.u32 2139095040, %v1196_v15  ;;  %v277_v17 = vand.u32 2147483647, %v1196_v15 }
  0x96   : > { %v259_v18 = vpop.f32.mrf.mxu0 }
  0x97   : > { %v281_v19 = vshrl.u32 %v280_v16, 23  ;;  %v272_v20 = vmul.f32 %v259_v18, %v259_v18  ;;  %v284_v21 = vand.u32 8388607, %v277_v17 }
  0x99   : > { %v1050_v22 = vadd.s32 4294967169, %v281_v19  ;;  %v274_v23 = vsub.f32 %v259_v18, %v272_v20  ;;  %v285_v24 = vor.u32 8388608, %v284_v21 }
  0x9b   : > { %v287_v25 = vadd.s32 1, %v1050_v22  ;;  %v1202_v26 = vadd.f32 %v274_v23, %v270_v12  ;;  %v1205_v28 = vshll.u32 %v285_v24, 8 }
  0x9d   : > { %vm288_vm2 = vcmp.gt.s32.totalorder %v287_v25, 0  ;;  %v434_v27 = vand.u32 2139095040, %v1202_v26  ;;  %v1210_v34 = vand.u32 65535, %v1205_v28  ;;  %v431_v35 = vand.u32 2147483647, %v1202_v26 }
  0x9e   : > { %v289_v29 = vsel %vm288_vm2, %v287_v25, 0  ;;  %v327_v19 = vshrl.u32 %v1205_v28, 16 }
  0x9f   : > { %v291_v30 = vand.u32 31, %v289_v29  ;;  %v435_v31 = vshrl.u32 %v434_v27, 23  ;;  %v1207_v32 = vshrl.u32 %v289_v29, 5  ;;  %v1228_v5 = vand.u32 8388607, %v431_v35 }
  0xa1   : > { %v292_v33 = vsub.s32 32, %v291_v30  ;;  %v303_v37 = vshll.u32 %v1134_v36, %v291_v30  ;;  %v306_v39 = vshll.u32 %v1135_v38, %v291_v30  ;;  %v1053_v40 = vadd.s32 4294967169, %v435_v31 }
  0xa2   : > { %v294_v42 = vshll.u32 %v1136_v41, %v291_v30  ;;  %v297_v48 = vshll.u32 %v1138_v46, %v291_v30  ;;  %v300_v52 = vshll.u32 %v1139_v50, %v291_v30  ;;  %vm312_vm3 = vcmp.lt.s32.totalorder %v1207_v32, 4 }
  0xa3   : > { %v304_v43 = vshrl.u32 %v1135_v38, %v292_v33  ;;  %v307_v45 = vshrl.u32 %v1137_v44, %v292_v33  ;;  %v295_v47 = vshrl.u32 %v1138_v46, %v292_v33  ;;  %v441_v49 = vadd.s32 1, %v1053_v40 }
  0xa4   : > { %v298_v51 = vshrl.u32 %v1139_v50, %v292_v33  ;;  %v301_v53 = vshrl.u32 %v1134_v36, %v292_v33  ;;  %v293_v57 = vshrl.u32 %v1136_v41, %v292_v33  ;;  %vm309_vm5 = vcmp.lt.s32.totalorder %v1207_v32, 1 }
  0xa5   : > { %v305_v54 = vor.u32 %v304_v43, %v303_v37  ;;  %v308_v55 = vor.u32 %v307_v45, %v306_v39  ;;  %v296_v56 = vor.u32 %v295_v47, %v294_v42  ;;  %vm442_vm4 = vcmp.gt.s32.totalorder %v441_v49, 0 }
  0xa6   : > { %v299_v58 = vor.u32 %v298_v51, %v297_v48  ;;  %v302_v59 = vor.u32 %v301_v53, %v300_v52  ;;  %v443_v62 = vsel %vm442_vm4, %v441_v49, 0  ;;  %vm311_vm6 = vcmp.lt.s32.totalorder %v1207_v32, 3 }
  0xa7   : > { %v318_v60 = vsel %vm312_vm3, %v305_v54, 920167782  ;;  %v322_v61 = vsel %vm312_vm3, %v308_v55, 1326507024  ;;  %v1223_v63 = vand.u32 31, %v443_v62  ;;  %v1230_v6 = vshrl.u32 %v443_v62, 5 }
  0xa8   : > { %v314_v0 = vsel %vm312_vm3, %v302_v59, 2102212464  ;;  %v317_v1 = vsel %vm309_vm5, %v296_v56, %v299_v58  ;;  %v319_v2 = vsel %vm311_vm6, %v302_v59, %v318_v60  ;;  %v321_v3 = vsel %vm309_vm5, %v299_v58, %v302_v59 }
  0xa9   : > { %v323_v4 = vsel %vm311_vm6, %v305_v54, %v322_v61  ;;  %v1233_v7 = vsub.s32 32, %v1223_v63  ;;  %vm310_vm7 = vcmp.lt.s32.totalorder %v1207_v32, 2  ;;  %v313_v8 = vsel %vm309_vm5, %v293_v57, %v296_v56 }
  0xaa   : > { %v460_v9 = vshll.u32 %v1135_v38, %v1223_v63  ;;  %v315_v10 = vsel %vm311_vm6, %v299_v58, %v314_v0  ;;  %v320_v11 = vsel %vm310_vm7, %v317_v1, %v319_v2  ;;  %v324_v12 = vsel %vm310_vm7, %v321_v3, %v323_v4 }
  0xab   : > { %v458_v13 = vshrl.u32 %v1135_v38, %v1233_v7  ;;  %v461_v14 = vshrl.u32 %v1137_v44, %v1233_v7  ;;  %v328_v16 = vand.u32 65535, %v324_v12  ;;  %v329_v18 = vshrl.u32 %v324_v12, 16 }
  0xac   : > { %v350_v20 = vand.u32 65535, %v320_v11  ;;  %v351_v21 = vshrl.u32 %v320_v11, 16  ;;  %v457_v22 = vshll.u32 %v1134_v36, %v1223_v63  ;;  %vm466_vm8 = vcmp.lt.s32.totalorder %v1230_v6, 4 }
  0xad   : > { %v462_v23 = vor.u32 %v461_v14, %v460_v9  ;;  %v331_v24 = vmul.u32 %v329_v18, %v1210_v34  ;;  %v1250_v25 = vsel %vm310_vm7, %v313_v8, %v315_v10  ;;  %v332_v27 = vmul.u32 %v328_v16, %v327_v19 }
  0xae   : > { %v353_v29 = vmul.u32 %v351_v21, %v1210_v34  ;;  %v439_v30 = vor.u32 8388608, %v1228_v5  ;;  %v459_v31 = vor.u32 %v458_v13, %v457_v22  ;;  %v330_v33 = vmul.u32 %v328_v16, %v1210_v34 }
  0xaf   : > { %v333_v37 = vmul.u32 %v329_v18, %v327_v19  ;;  %v334_v38 = vshll.u32 %v331_v24, 16  ;;  %v476_v39 = vsel %vm466_vm8, %v462_v23, 1326507024  ;;  %v335_v40 = vshrl.u32 %v331_v24, 16 }
  0xb0   : > { %v352_v42 = vmul.u32 %v350_v20, %v1210_v34  ;;  %v354_v43 = vmul.u32 %v350_v20, %v327_v19  ;;  %v336_v32 = vshll.u32 %v332_v27, 16  ;;  %v356_v45 = vshll.u32 %v353_v29, 16 }
  0xb1   : > { %vm338_vm9 = vc.u32 %v330_v33, %v334_v38  ;;  %v340_v44 = vadd.s32 %v334_v38, %v330_v33  ;;  %v337_v47 = vshrl.u32 %v332_v27, 16  ;;  %v1140_v48 = vmov 0  }
  0xb2   : > { %v339_v49 = vsel %vm338_vm9, 1, %v1140_v48  ;;  %v355_v51 = vmul.u32 %v351_v21, %v327_v19  ;;  %v358_v52 = vshll.u32 %v354_v43, 16  ;;  %vm360_vm11 = vc.u32 %v352_v42, %v356_v45 }
  0xb3   : > { %v341_v53 = vadd.s32 %v339_v49, %v333_v37  ;;  %vm342_vm10 = vc.u32 %v340_v44, %v336_v32  ;;  %v362_v54 = vadd.s32 %v356_v45, %v352_v42  ;;  %v361_v56 = vsel %vm360_vm11, 1, %v1140_v48 }
  0xb4   : > { %v343_v55 = vsel %vm342_vm10, 1, %v1140_v48  ;;  %v448_v34 = vshll.u32 %v1136_v41, %v1223_v63  ;;  %v449_v57 = vshrl.u32 %v1138_v46, %v1233_v7  ;;  %v357_v59 = vshrl.u32 %v353_v29, 16 }
  0xb5   : > { %v345_v58 = vadd.s32 %v343_v55, %v341_v53  ;;  %v363_v60 = vadd.s32 %v361_v56, %v355_v51  ;;  %vm364_vm12 = vc.u32 %v362_v54, %v358_v52  ;;  %v451_v0 = vshll.u32 %v1138_v46, %v1223_v63 }
  0xb6   : > { %v365_v61 = vsel %vm364_vm12, 1, %v1140_v48  ;;  %v1266_v62 = vor.u32 %v449_v57, %v448_v34  ;;  %v452_v1 = vshrl.u32 %v1139_v50, %v1233_v7  ;;  %v454_v4 = vshll.u32 %v1139_v50, %v1223_v63 }
  0xb7   : > { %v346_v2 = vadd.s32 %v345_v58, %v335_v40  ;;  %v367_v3 = vadd.s32 %v365_v61, %v363_v60  ;;  %v455_v5 = vshrl.u32 %v1134_v36, %v1233_v7  ;;  %v472_v8 = vsel %vm466_vm8, %v459_v31, 920167782 }
  0xb8   : > { %v359_v9 = vshrl.u32 %v354_v43, 16  ;;  %v1278_v10 = vor.u32 %v452_v1, %v451_v0  ;;  %vm463_vm13 = vcmp.lt.s32.totalorder %v1230_v6, 1  ;;  %vm465_vm14 = vcmp.lt.s32.totalorder %v1230_v6, 3 }
  0xb9   : > { %v1281_v46 = vadd.s32 %v346_v2, %v337_v47  ;;  %v368_v11 = vadd.s32 %v367_v3, %v357_v59  ;;  %v456_v12 = vor.u32 %v455_v5, %v454_v4  ;;  %v1284_v13 = vadd.s32 %v362_v54, %v358_v52 }
  0xba   : > { %v471_v36 = vsel %vm463_vm13, %v1266_v62, %v1278_v10  ;;  %v477_v50 = vsel %vm465_vm14, %v459_v31, %v476_v39  ;;  %v1292_v63 = vshll.u32 %v439_v30, 8  ;;  %v370_v16 = vmul.u32 %v1205_v28, %v1250_v25 }
  0xbb   : > { %v369_v14 = vadd.s32 %v368_v11, %v359_v9  ;;  %vm372_vm15 = vc.u32 %v1281_v46, %v1284_v13  ;;  %vm464_vm0 = vcmp.lt.s32.totalorder %v1230_v6, 2  ;;  %v473_v18 = vsel %vm465_vm14, %v456_v12, %v472_v8 }
  0xbc   : > { %v475_v19 = vsel %vm463_vm13, %v1278_v10, %v456_v12  ;;  %v474_v21 = vsel %vm464_vm0, %v471_v36, %v473_v18  ;;  %v480_v28 = vand.u32 65535, %v1292_v63  ;;  %v481_v23 = vshrl.u32 %v1292_v63, 16 }
  0xbd   : > { %v373_v20 = vadd.s32 1, %v369_v14  ;;  %v478_v22 = vsel %vm464_vm0, %v475_v19, %v477_v50  ;;  %v504_v27 = vand.u32 65535, %v474_v21  ;;  %v505_v30 = vshrl.u32 %v474_v21, 16 }
  0xbe   : > { %v482_v24 = vand.u32 65535, %v478_v22  ;;  %v483_v25 = vshrl.u32 %v478_v22, 16  ;;  %v468_v57 = vsel %vm466_vm8, %v456_v12, 2102212464  ;;  %v447_v2 = vshrl.u32 %v1136_v41, %v1233_v7 }
  0xbf   : > { %v374_v29 = vsel %vm372_vm15, %v373_v20, %v369_v14  ;;  %v507_v38 = vmul.u32 %v505_v30, %v480_v28  ;;  %v508_v39 = vmul.u32 %v504_v27, %v481_v23  ;;  %v506_v44 = vmul.u32 %v504_v27, %v480_v28 }
  0xc0   : > { %v375_v31 = vadd.s32 %v374_v29, %v370_v16  ;;  %v485_v33 = vmul.u32 %v483_v25, %v480_v28  ;;  %v486_v37 = vmul.u32 %v482_v24, %v481_v23  ;;  %v484_v42 = vmul.u32 %v482_v24, %v480_v28 }
  0xc1   : > { %v487_v32 = vmul.u32 %v483_v25, %v481_v23  ;;  %v510_v45 = vshll.u32 %v507_v38, 16  ;;  %v512_v53 = vshll.u32 %v508_v39, 16  ;;  %v509_v34 = vmul.u32 %v505_v30, %v481_v23 }
  0xc2   : > { %v376_v40 = vadd.s32 536870912, %v375_v31  ;;  %v488_v43 = vshll.u32 %v485_v33, 16  ;;  %v490_v49 = vshll.u32 %v486_v37, 16  ;;  %v489_v61 = vshrl.u32 %v485_v33, 16 }
  0xc3   : > { %vm514_vm2 = vc.u32 %v506_v44, %v510_v45  ;;  %v516_v54 = vadd.s32 %v510_v45, %v506_v44  ;;  %v491_v3 = vshrl.u32 %v486_v37, 16  ;;  %v511_v4 = vshrl.u32 %v507_v38, 16 }
  0xc4   : > { %v1310_v47 = vshrl.u32 %v376_v40, 30  ;;  %vm492_vm1 = vc.u32 %v484_v42, %v488_v43  ;;  %v494_v51 = vadd.s32 %v488_v43, %v484_v42  ;;  %v515_v59 = vsel %vm514_vm2, 1, %v1140_v48 }
  0xc5   : > { %v493_v52 = vsel %vm492_vm1, 1, %v1140_v48  ;;  %vm518_vm4 = vc.u32 %v516_v54, %v512_v53  ;;  %v517_v1 = vadd.s32 %v515_v59, %v509_v34  ;;  %v467_v12 = vsel %vm463_vm13, %v447_v2, %v1266_v62 }
  0xc6   : > { %v378_v55 = vshll.u32 %v1310_v47, 30  ;;  %v495_v56 = vadd.s32 %v493_v52, %v487_v32  ;;  %vm496_vm3 = vc.u32 %v494_v51, %v490_v49  ;;  %v519_v5 = vsel %vm518_vm4, 1, %v1140_v48 }
  0xc7   : > { %v497_v58 = vsel %vm496_vm3, 1, %v1140_v48  ;;  %v521_v11 = vadd.s32 %v519_v5, %v517_v1  ;;  %v469_v36 = vsel %vm465_vm14, %v1278_v10, %v468_v57  ;;  %v513_v16 = vshrl.u32 %v508_v39, 16 }
  0xc8   : > { %v379_v60 = vsub.s32 %v375_v31, %v378_v55  ;;  %v499_v0 = vadd.s32 %v497_v58, %v495_v56  ;;  %v520_v18 = vadd.s32 %v516_v54, %v512_v53  ;;  %v470_v48 = vsel %vm464_vm0, %v467_v12, %v469_v36 }
  0xc9   : > { %v522_v41 = vadd.s32 %v521_v11, %v511_v4  ;;  %v524_v62 = vmul.u32 %v1292_v63, %v470_v48  ;;  %v371_v10 = vadd.s32 %v1284_v13, %v1281_v46  ;;  %vm279_vm9 = vcmp.lt.s32.totalorder %v1196_v15, 0 }
  0xca   : > { %vm380_vm5 = vcmp.lt.s32.totalorder %v379_v60, 0  ;;  %v381_v8 = vsub.s32 0, %v379_v60  ;;  %v500_v9 = vadd.s32 %v499_v0, %v489_v61  ;;  %vm1335_vm10 = vcmp.le.f32.partialorder %v277_v17, 0.7853982 }
  0xcb   : > { %v523_v19 = vadd.s32 %v522_v41, %v513_v16  ;;  %vm1347_vm12 = vcmp.le.f32.partialorder %v431_v35, 0.7853982  ;;  %vm433_vm13 = vcmp.lt.s32.totalorder %v1202_v26, 0  ;;  %vm420_vm14 = vweird.f32 %v1196_v15 }
  0xcc   : > { %v382_v50 = vsel %vm380_vm5, %v381_v8, %v379_v60  ;;  %v501_v14 = vadd.s32 %v500_v9, %v491_v3  ;;  %v401_v9 = vsub.s32 4, %v1310_v47 }
  0xcd   : > { %v383_v7 = vclz %v382_v50  ;;  %v527_v21 = vadd.s32 1, %v523_v19 }
  0xce   : > { %vm526_vm6 = vc.u32 %v501_v14, %v520_v18  ;;  %v525_v56 = vadd.s32 %v520_v18, %v501_v14  ;;  %v402_v16 = vsel %vm279_vm9, %v401_v9, %v1310_v47 }
  0xcf   : > { %v1051_v20 = vadd.s32 4294967294, %v383_v7  ;;  %v528_v28 = vsel %vm526_vm6, %v527_v21, %v523_v19  ;;  %v404_v35 = vsel %vm1335_vm10, 0, %v402_v16 }
  0xd0   : > { %v529_v25 = vadd.s32 %v528_v28, %v524_v62 }
  0xd1   : > { %vm1052_vm7 = vcmp.lt.s32.totalorder %v1051_v20, 0 }
  0xd2   : > { %v386_v22 = vsel %vm1052_vm7, 0, %v1051_v20  ;;  %v530_v6 = vadd.s32 536870912, %v529_v25 }
  0xd3   : > { %v387_v23 = vsub.s32 32, %v386_v22  ;;  %v391_v24 = vsub.s32 4294967266, %v386_v22  ;;  %v388_v27 = vshll.u32 %v379_v60, %v386_v22 }
  0xd4   : > { %v531_v37 = vshrl.u32 %v530_v6, 30 }
  0xd5   : > { %v389_v29 = vshrl.u32 %v371_v10, %v387_v23  ;;  %v392_v30 = vadd.s32 127, %v391_v24 }
  0xd6   : > { %v532_v39 = vshll.u32 %v531_v37, 30  ;;  %v555_v18 = vsub.s32 4, %v531_v37 }
  0xd7   : > { %v390_v31 = vor.u32 %v389_v29, %v388_v27  ;;  %v393_v33 = vshll.u32 %v392_v30, 23 }
  0xd8   : > { %v533_v63 = vsub.s32 %v529_v25, %v532_v39  ;;  %v556_v62 = vsel %vm433_vm13, %v555_v18, %v531_v37  ;;  %v729_v25 = vadd.s32 3, %v404_v35 }
  0xd9   : > { %v394_v38 = vor.u32 4788187, %v393_v33  ;;  %v397_v42 = vcvt.s32.f32 %v390_v31  ;;  %v558_v47 = vsel %vm1347_vm12, 0, %v556_v62 }
  0xda   : > { %vm534_vm8 = vcmp.lt.s32.totalorder %v533_v63, 0  ;;  %v535_v32 = vsub.s32 0, %v533_v63  ;;  %v730_v39 = vand.u32 3, %v729_v25 }
  0xdb   : > { %v395_v40 = vand.u32 2147483647, %v394_v38  ;;  %v884_v38 = vadd.s32 3, %v558_v47 }
  0xdc   : > { %v536_v46 = vsel %vm534_vm8, %v535_v32, %v533_v63  ;;  %vm732_vm15 = vcmp.eq.s32.totalorder %v730_v39, 0  ;;  %vm731_vm1 = vcmp.lt.s32.totalorder %v730_v39, 2  ;;  %vm735_vm2 = vcmp.eq.s32.totalorder %v730_v39, 2 }
  0xdd   : > { %v398_v43 = vmul.f32 %v397_v42, %v395_v40  ;;  %v537_v13 = vclz %v536_v46 }
  0xdf   : > { %v399_v44 = vxor.u32 2147483648, %v398_v43  ;;  %v1054_v52 = vadd.s32 4294967294, %v537_v13  ;;  %v885_v13 = vand.u32 3, %v884_v38 }
  0xe1   : > { %v400_v49 = vsel %vm279_vm9, %v399_v44, %v398_v43  ;;  %vm1055_vm11 = vcmp.lt.s32.totalorder %v1054_v52, 0  ;;  %v575_v43 = vand.u32 3, %v558_v47  ;;  %vm886_vm5 = vcmp.lt.s32.totalorder %v885_v13, 2 }
  0xe2   : > { %v403_v51 = vsel %vm1335_vm10, %v1196_v15, %v400_v49  ;;  %v540_v55 = vsel %vm1055_vm11, 0, %v1054_v52  ;;  %vm887_vm7 = vcmp.eq.s32.totalorder %v885_v13, 0  ;;  %vm890_vm8 = vcmp.eq.s32.totalorder %v885_v13, 2 }
  0xe3   : > { %v405_v53 = vmul.f32 %v403_v51, %v403_v51  ;;  %v541_v34 = vsub.s32 32, %v540_v55  ;;  %v545_v57 = vsub.s32 4294967266, %v540_v55  ;;  %v542_v17 = vshll.u32 %v533_v63, %v540_v55 }
  0xe4   : > { %v421_v63 = vand.u32 3, %v404_v35  ;;  %vm576_vm3 = vcmp.lt.s32.totalorder %v575_v43, 2  ;;  %vm577_vm4 = vcmp.eq.s32.totalorder %v575_v43, 0  ;;  %vm580_vm6 = vcmp.eq.s32.totalorder %v575_v43, 2 }
  0xe5   : > { %v413_v54 = vmul.f32 -0.00019511016, %v405_v53  ;;  %v543_v59 = vshrl.u32 %v525_v56, %v541_v34  ;;  %v546_v60 = vadd.s32 127, %v545_v57  ;;  %v406_v61 = vmul.f32 -0.001358992, %v405_v53 }
  0xe6   : > { %vm423_vm0 = vcmp.eq.s32.totalorder %v421_v63, 0  ;;  %vm574_vm9 = vweird.f32 %v1202_v26  ;;  %vm426_vm10 = vcmp.eq.s32.totalorder %v421_v63, 2  ;;  %vm422_vm11 = vcmp.lt.s32.totalorder %v421_v63, 2 }
  0xe7   : > { %v414_v58 = vadd.f32 0.008332121, %v413_v54  ;;  %v544_v0 = vor.u32 %v543_v59, %v542_v17  ;;  %v547_v1 = vshll.u32 %v546_v60, 23  ;;  %v407_v4 = vadd.f32 0.041655596, %v406_v61 }
  0xe9   : > { %v415_v2 = vmul.f32 %v414_v58, %v405_v53  ;;  %v548_v3 = vor.u32 4788187, %v547_v1  ;;  %v551_v8 = vcvt.s32.f32 %v544_v0  ;;  %v408_v36 = vmul.f32 %v407_v4, %v405_v53 }
  0xeb   : > { %v549_v5 = vand.u32 2147483647, %v548_v3  ;;  %v416_v11 = vadd.f32 -0.16666654, %v415_v2  ;;  %v409_v19 = vadd.f32 -0.4999988, %v408_v36 }
  0xed   : > { %v552_v12 = vmul.f32 %v551_v8, %v549_v5  ;;  %v417_v41 = vmul.f32 %v416_v11, %v405_v53  ;;  %v410_v10 = vmul.f32 %v409_v19, %v405_v53  ;;  %v1075_v8 = vld [vmem:[%s1396_s2] sm:$0xff] }
  0xef   : > { %v553_v50 = vxor.u32 2147483648, %v552_v12  ;;  %v418_v21 = vadd.f32 1.0, %v417_v41  ;;  %v411_v6 = vadd.f32 1.0, %v410_v10  ;;  %v937_v41 = vld [vmem:[%s1397_s3] sm:$0xff] }
  0xf1   : > { %v554_v7 = vsel %vm433_vm13, %v553_v50, %v552_v12  ;;  %v419_v27 = vmul.f32 %v418_v21, %v403_v51  ;;  %v427_v32 = vxor.u32 2147483648, %v411_v6 }
  0xf2   : > { %v557_v48 = vsel %vm1347_vm12, %v1202_v26, %v554_v7  ;;  %v1076_v26 = vld [vmem:[%s1396_s2 + $0x8] sm:$0xff]  ;;  %vm911_vm12 = vcmask 261120  }
  0xf3   : > { %v559_v20 = vmul.f32 %v557_v48, %v557_v48  ;;  %v424_v40 = vxor.u32 2147483648, %v419_v27  ;;  %v737_v53 = vsel %vm735_vm2, %v427_v32, %v419_v27  ;;  %v428_v0 = vsel %vm426_vm10, %v427_v32, %v419_v27 }
  0xf5   : > { %v560_v22 = vmul.f32 -0.001358992, %v559_v20  ;;  %v567_v28 = vmul.f32 -0.00019511016, %v559_v20  ;;  %v734_v51 = vsel %vm732_vm15, %v411_v6, %v424_v40  ;;  %v425_v55 = vsel %vm423_vm0, %v411_v6, %v424_v40 }
  0xf6   : > { %v738_v54 = vsel %vm731_vm1, %v734_v51, %v737_v53  ;;  %v429_v2 = vsel %vm422_vm11, %v425_v55, %v428_v0 }
  0xf7   : > { %v561_v23 = vadd.f32 0.041655596, %v560_v22  ;;  %v568_v24 = vadd.f32 0.008332121, %v567_v28  ;;  %v739_v60 = vsel %vm420_vm14, nan, %v738_v54  ;;  %v430_v4 = vsel %vm420_vm14, nan, %v429_v2 }
  0xf9   : > { %v562_v29 = vmul.f32 %v561_v23, %v559_v20  ;;  %v569_v30 = vmul.f32 %v568_v24, %v559_v20 }
  0xfb   : > { %v563_v31 = vadd.f32 -0.4999988, %v562_v29  ;;  %v570_v33 = vadd.f32 -0.16666654, %v569_v30 }
  0xfd   : > { %v564_v42 = vmul.f32 %v563_v31, %v559_v20  ;;  %v571_v37 = vmul.f32 %v570_v33, %v559_v20 }
  0xff   : > { %v565_v44 = vadd.f32 1.0, %v564_v42  ;;  %v572_v46 = vadd.f32 1.0, %v571_v37 }
 0x101   : > { %v573_v45 = vmul.f32 %v572_v46, %v557_v48  ;;  %v581_v49 = vxor.u32 2147483648, %v565_v44 }
 0x103   : > { %v578_v52 = vxor.u32 2147483648, %v573_v45  ;;  %v892_v34 = vsel %vm890_vm8, %v581_v49, %v573_v45  ;;  %v582_v58 = vsel %vm580_vm6, %v581_v49, %v573_v45 }
 0x105   : > { %v889_v56 = vsel %vm887_vm7, %v565_v44, %v578_v52  ;;  %v579_v57 = vsel %vm577_vm4, %v565_v44, %v578_v52 }
 0x106   : > { %v893_v17 = vsel %vm886_vm5, %v889_v56, %v892_v34  ;;  %v583_v59 = vsel %vm576_vm3, %v579_v57, %v582_v58 }
 0x107   : > { %v894_v61 = vsel %vm574_vm9, nan, %v893_v17  ;;  %v584_v3 = vsel %vm574_vm9, nan, %v583_v59 }
 0x108   : > { %v900_v1 = vpack.c.bf16 %v894_v61, %v739_v60  ;;  %v899_v5 = vpack.c.bf16 %v584_v3, %v430_v4 }
 0x10a   : > { %924 = vmatpush.bf16.msra.mxu1 %v900_v1  ;;  %1077 = vmatpush.bf16.msra.mxu3 %v900_v1 }
 0x10e   : > { %925 = vmatpush.bf16.msra.mxu1 %v899_v5  ;;  %1078 = vmatpush.bf16.msra.mxu3 %v899_v5 }
 0x111   : > { %1071 = vmatmul.msk.bf16.vlgmr.msra.gmra.mxu3 %vm911_vm12, %v1076_v26  ;;  %1070 = vmatmul.msk.bf16.vlgmr.msra.gmra.mxu1 %vm911_vm12, %v1075_v8 }
 0x18e   : > { %v927_v9 = vpop.f32.mrf.mxu1 }
 0x18f   : > { %v938_v16 = vmul.f32 %v927_v9, %v927_v9 }
 0x194   : > { %v932_v15 = vpop.f32.mrf.mxu3 }
 0x195   : > { %v940_v50 = vmul.f32 %v932_v15, %v932_v15 }
 0x196   : > { %v929_v36 = vpop.f32.mrf.mxu1 }
 0x197   : > { %v939_v14 = vmul.f32 %v929_v36, %v929_v36 }
 0x19c   : > { %v934_v11 = vpop.f32.mrf.mxu3 }
 0x19d   : > { %v941_v12 = vmul.f32 %v934_v11, %v934_v11 }
 0x19f   : > { %957 = vmatpush.msra.mxu2 %v941_v12 }
 0x1a1   : > { %958 = vmatpush.msra.mxu2 %v940_v50 }
 0x1a3   : > { %959 = vmatpush.msra.mxu2 %v939_v14 }
 0x1a5   : > { %960 = vmatpush.msra.mxu2 %v938_v16 }
 0x1a6   : > { %1072 = vmatmul.msk.f32.vlgmr.msra.gmra.mxu2 %vm911_vm12, %v937_v41 }
 0x229   : > { %v962_v7 = vpop.f32.mrf.mxu2 }
 0x22a   : > { %965 = vst [vmem:[%s223_s10] sm:$0xff] %v962_v7 }
 0x22b PF: > { %s14_s17 = sadd.s32 1, %s1132_s17   ;;  %s1403_s15 = smov %s1128_s16 }
 0x22c   : > { %p11_p5 = scmp.ge.s32.totalorder %s14_s17, 4   ;;  %s1404_s16 = smov %s1406_s18 }
 0x22e   :  { %13 = sbr.rel (!%p11_p5) target bundleno = 2 (0x2), region = 66 }

</bundles_post_ra>
